<compile_context>
chip_gen: v6e
topology: v6e:2x2x1
jax: 0.10.0
libtpu: 0.0.40
codegen_flags: <defaults>
</compile_context>

<pallas_src>
import jax
import jax.numpy as jnp
from jax.experimental import pallas as pl
from jax.experimental.pallas import tpu as pltpu


def _round_up(x, m):
    return (x + m - 1) // m * m


def _round_down(x, m):
    return (x // m) * m


def _cdiv(a, b):
    return -(-a // b)


def _vmem_capacity_bytes():
    """Physical VMEM of the local TPU (with safe fallbacks)."""
    try:
        return int(pltpu.get_tpu_info().vmem_capacity_bytes)
    except Exception:
        try:
            kind = jax.devices()[0].device_kind.lower()
        except Exception:
            kind = ""
        if "7" in kind:               # v7x: 64 MiB per TensorCore
            return 64 * 1024 * 1024
        return 128 * 1024 * 1024      # v4 / v5e / v5p / v6e


def _select_tiles(M, E_pad, H, compute_bytes, out_bytes, vmem_limit, tm_hint, th_hint):
    """Pick (tm, th) so the double-buffered working set fits the VMEM budget."""
    budget = int(vmem_limit * 0.9)

    def footprint(tm, th, nbuf_w=2):
        f = 2 * tm * E_pad * compute_bytes           # x double buffer
        f += nbuf_w * E_pad * th * compute_bytes     # w1 buffers
        f += nbuf_w * th * E_pad * compute_bytes     # w2 buffers
        f += 2 * 8 * th * 4 + 2 * 8 * E_pad * 4      # b1 / b2 (sublane-padded)
        f += 2 * tm * E_pad * out_bytes              # output double buffer
        f += tm * E_pad * 4                          # f32 accumulator scratch
        f += tm * th * (4 + compute_bytes)           # h temporaries (f32 + compute)
        return f

    # H is a reduction axis: th must divide H exactly (no padded garbage may
    # enter the accumulator) and be a multiple of 128 (or all of H).
    if th_hint is not None and H % th_hint == 0 and (th_hint % 128 == 0 or th_hint == H):
        th = th_hint
    else:
        th = next((c for c in (2048, 1024, 512, 256, 128) if c <= H and H % c == 0), H)

    # M rows are independent: a partial last tile only produces discarded rows.
    if tm_hint is not None and (tm_hint % 8 == 0 or tm_hint >= M):
        tm = min(tm_hint, M)
    elif M <= 256:
        tm = M                        # too small to split usefully across cores
    else:
        # Bigger tm => weights re-streamed fewer times (v5e/v6e with big VMEM);
        # keep >= 2 M tiles so v7x's second TensorCore has work.
        tm_cap = 1024 if vmem_limit >= (72 << 20) else 256
        tm = min(tm_cap, max(128, _round_up((M + 1) // 2, 8)))

    # Shrink to fit the VMEM budget (prefer halving th first: keeps M tiles big
    # so weight re-streaming per row stays low).
    while footprint(tm, th) > budget:
        half_th = th // 2
        if half_th >= 128 and half_th % 128 == 0 and H % half_th == 0:
            th = half_th
        elif tm > 8:
            new_tm = max(8, _round_down(tm // 2, 8))
            if new_tm == tm:
                break
            tm = new_tm
        else:
            break

    # Decode / small-M regime: one M tile, many H steps -> weight-streaming
    # bound; deepen weight buffering if it still fits.
    deep_w = (_cdiv(M, tm) == 1 and (H // th) >= 4
              and footprint(tm, th, 3) <= budget)
    return tm, th, deep_w, footprint(tm, th, 3 if deep_w else 2)


def _ffn_kernel(x_ref, w1_ref, b1_ref, w2_ref, b2_ref, o_ref, acc_ref):
    """One (tm, th) step of relu(x @ w1 + b1) @ w2, accumulated over the H axis."""
    h_idx = pl.program_id(1)

    @pl.when(h_idx == 0)
    def _():
        acc_ref[...] = jnp.zeros_like(acc_ref)

    # x is already in the MXU compute dtype (cast once in the wrapper).
    h = jnp.dot(x_ref[...], w1_ref[...], preferred_element_type=jnp.float32)
    h = jnp.maximum(h + b1_ref[...], 0.0)    # bias + ReLU in f32, per H slice (exact)
    # TODO(synk): training-mode dropout (Bernoulli mask) omitted; eval semantics only.

    acc_ref[...] += jnp.dot(h.astype(w2_ref.dtype), w2_ref[...],
                            preferred_element_type=jnp.float32)

    @pl.when(h_idx == pl.num_programs(1) - 1)
    def _():
        o_ref[...] = (acc_ref[...] + b2_ref[...]).astype(o_ref.dtype)


def feed_forward(x, w1, b1, w2, b2, *, compute_dtype=jnp.bfloat16, out_dtype=None,
                 tm=None, th=None, vmem_limit_bytes=None):
    """FeedForward forward pass (eval mode).

    x: (batch, seq, E). w1: (E, H), b1: (H,), w2: (H, E), b2: (E,).
    Weights are stored (in, out), i.e. transposed relative to torch nn.Linear.
    compute_dtype: MXU operand dtype. bf16 is the perf path; float32 is
        TEST-ONLY (exact torch semantics, but f32 MXU is slow on v5e/v6e).
    out_dtype: output dtype (defaults to x.dtype; pass bf16 in bf16 models to
        halve writeback bytes and the output double buffer).
    tm/th: optional tile-size hints; otherwise chosen per-generation from the
        chip's VMEM capacity.
    """
    batch, seq, E = x.shape
    H = w1.shape[1]
    M = batch * seq

    out_dtype = x.dtype if out_dtype is None else jnp.dtype(out_dtype)
    compute_dtype = jnp.dtype(compute_dtype)
    compute_bytes = compute_dtype.itemsize
    out_bytes = jnp.dtype(out_dtype).itemsize

    if vmem_limit_bytes is None:
        # ~48 MiB on v7x (64 MiB physical), ~96 MiB on v5e/v6e (128 MiB physical).
        vmem_limit_bytes = min(int(_vmem_capacity_bytes() * 0.75), 100 * 1024 * 1024)

    # Lane-dense output: pad E up to a multiple of 128 so stores are unmasked.
    E_pad = max(128, _round_up(E, 128))

    tm_, th_, deep_w, fp = _select_tiles(M, E_pad, H, compute_bytes, out_bytes,
                                         vmem_limit_bytes, tm, th)
    assert fp <= vmem_limit_bytes, (
        f"FFN tile working set ({fp} B) exceeds vmem_limit_bytes "
        f"({vmem_limit_bytes} B) for E_pad={E_pad}, H={H}; an output-E tiling "
        f"axis would be needed for this shape.")

    n_m_tiles = _cdiv(M, tm_)
    grid = (n_m_tiles, H // th_)

    # Cast x once in the wrapper (perf review #1), then pad E if needed.
    x2d = x.reshape(M, E).astype(compute_dtype)
    w1c = w1.astype(compute_dtype)
    w2c = w2.astype(compute_dtype)
    b2f = b2.astype(jnp.float32)
    if E_pad != E:
        x2d = jnp.pad(x2d, ((0, 0), (0, E_pad - E)))
        w1c = jnp.pad(w1c, ((0, E_pad - E), (0, 0)))
        w2c = jnp.pad(w2c, ((0, 0), (0, E_pad - E)))
        b2f = jnp.pad(b2f, (0, E_pad - E))
    b1_2d = b1.reshape(1, H).astype(jnp.float32)
    b2_2d = b2f.reshape(1, E_pad)

    def _w_spec(shape, index_map):
        # Deeper buffering only in the weight-streaming-bound decode regime.
        if deep_w:
            return pl.BlockSpec(shape, index_map, pipeline_mode=pl.Buffered(3))
        return pl.BlockSpec(shape, index_map)

    cost = pl.CostEstimate(
        flops=4 * M * E_pad * H,                          # two matmuls
        transcendentals=0,
        bytes_accessed=(M * E_pad * compute_bytes                       # x (read once)
                        + n_m_tiles * 2 * E_pad * H * compute_bytes     # w1+w2 re-streamed per M tile
                        + (H + E_pad) * 4                               # biases
                        + M * E_pad * out_bytes),                       # output
    )

    out2d = pl.pallas_call(
        _ffn_kernel,
        out_shape=jax.ShapeDtypeStruct((M, E_pad), out_dtype),
        grid_spec=pltpu.PrefetchScalarGridSpec(
            num_scalar_prefetch=0,
            grid=grid,
            in_specs=[
                pl.BlockSpec((tm_, E_pad), lambda i, h: (i, 0)),   # x tile (M-tiled)
                _w_spec((E_pad, th_), lambda i, h: (0, h)),        # w1 H-slice
                pl.BlockSpec((1, th_), lambda i, h: (0, h)),       # b1 H-slice (f32)
                _w_spec((th_, E_pad), lambda i, h: (h, 0)),        # w2 H-slice
                pl.BlockSpec((1, E_pad), lambda i, h: (0, 0)),     # b2 (resident, f32)
            ],
            out_specs=pl.BlockSpec((tm_, E_pad), lambda i, h: (i, 0)),
            scratch_shapes=[pltpu.VMEM((tm_, E_pad), jnp.float32)],  # f32 accumulator
        ),
        compiler_params=pltpu.CompilerParams(
            dimension_semantics=("parallel", "arbitrary"),
            vmem_limit_bytes=vmem_limit_bytes,
        ),
        cost_estimate=cost,
    )(x2d, w1c, b1_2d, w2c, b2_2d)

    # NOTE: a partial last M tile reads padded x rows; rows are independent so
    # only discarded output rows are affected (do not add cross-row ops here).
    if E_pad != E:
        out2d = out2d[:, :E]
    return out2d.reshape(batch, seq, E)


def _init_params(key, embedding_size, ff_hidden_layer, dtype=jnp.float32):
    # Mimic torch nn.Linear default init: U(-1/sqrt(fan_in), 1/sqrt(fan_in)).
    k1, k2, k3, k4 = jax.random.split(key, 4)
    bound1 = 1.0 / jnp.sqrt(embedding_size)
    bound2 = 1.0 / jnp.sqrt(ff_hidden_layer)
    # Stored as (in, out) — transposed w.r.t. torch's (out, in).
    w1 = jax.random.uniform(k1, (embedding_size, ff_hidden_layer),
                            minval=-bound1, maxval=bound1, dtype=dtype)
    b1 = jax.random.uniform(k2, (ff_hidden_layer,),
                            minval=-bound1, maxval=bound1, dtype=dtype)
    w2 = jax.random.uniform(k3, (ff_hidden_layer, embedding_size),
                            minval=-bound2, maxval=bound2, dtype=dtype)
    b2 = jax.random.uniform(k4, (embedding_size,),
                            minval=-bound2, maxval=bound2, dtype=dtype)
    return w1, b1, w2, b2


if __name__ == "__main__":
    batch, seq, embedding_size, ff_hidden_layer = 2, 8, 32, 64
    key = jax.random.PRNGKey(0)
    kx, kp = jax.random.split(key)
    x = jax.random.normal(kx, (batch, seq, embedding_size), dtype=jnp.float32)
    w1, b1, w2, b2 = _init_params(kp, embedding_size, ff_hidden_layer)

    ref_f32 = jnp.maximum(x @ w1 + b1, 0.0) @ w2 + b2

    # 1) f32 compute path (test-only): eval-mode semantics of the torch module.
    out_f32 = jax.block_until_ready(
        feed_forward(x, w1, b1, w2, b2, compute_dtype=jnp.float32))
    assert out_f32.shape == (batch, seq, embedding_size)
    assert jnp.allclose(out_f32, ref_f32, atol=1e-5, rtol=1e-5)

    # 2) bf16-MXU path (default perf path) vs. a plain-JAX reference with the
    #    same casts (tight) and the f32 reference (loose).
    out_bf16 = jax.block_until_ready(feed_forward(x, w1, b1, w2, b2))
    h_ref = jnp.maximum(
        jnp.dot(x.astype(jnp.bfloat16), w1.astype(jnp.bfloat16),
                preferred_element_type=jnp.float32) + b1, 0.0)
    ref_bf16 = jnp.dot(h_ref.astype(jnp.bfloat16), w2.astype(jnp.bfloat16),
                       preferred_element_type=jnp.float32) + b2
    assert jnp.allclose(out_bf16, ref_bf16.astype(out_bf16.dtype),
                        atol=1e-4, rtol=1e-4)
    assert jnp.allclose(out_bf16, ref_f32, atol=5e-2, rtol=5e-2)

    # 3) bf16 output dtype (halves writeback bytes / output double buffer).
    out_b16o = jax.block_until_ready(
        feed_forward(x, w1, b1, w2, b2, out_dtype=jnp.bfloat16))
    assert out_b16o.dtype == jnp.bfloat16
    assert jnp.allclose(out_b16o.astype(jnp.float32), ref_bf16,
                        atol=3e-2, rtol=3e-2)

    # 4) Forced multi-tile grid (2 M tiles x 2 H reduction steps) exercising the
    #    f32 accumulator across H steps and the E-padding (96 -> 128) path.
    b2_, s2_, e2_, h2_ = 2, 32, 96, 256
    kx2, kp2 = jax.random.split(jax.random.PRNGKey(1))
    x2 = jax.random.normal(kx2, (b2_, s2_, e2_), dtype=jnp.float32)
    p2 = _init_params(kp2, e2_, h2_)
    ref2 = jnp.maximum(x2 @ p2[0] + p2[1], 0.0) @ p2[2] + p2[3]
    out2 = jax.block_until_ready(
        feed_forward(x2, *p2, compute_dtype=jnp.float32, tm=32, th=128))
    assert out2.shape == (b2_, s2_, e2_)
    assert jnp.allclose(out2, ref2, atol=1e-4, rtol=1e-4)

    print("KERNEL_OK")
</pallas_src>

<mosaic_0001>
module attributes {stable_mosaic.version = 11 : i64} {
  func.func @_ffn_kernel(%arg0: i32, %arg1: i32, %arg2: memref<16x128xf32, #tpu.memory_space<vmem>>, %arg3: memref<128x64xf32, #tpu.memory_space<vmem>>, %arg4: memref<1x64xf32, #tpu.memory_space<vmem>>, %arg5: memref<64x128xf32, #tpu.memory_space<vmem>>, %arg6: memref<1x128xf32, #tpu.memory_space<vmem>>, %arg7: memref<16x128xf32, #tpu.memory_space<vmem>>, %arg8: memref<16x128xf32, #tpu.memory_space<vmem>>) attributes {dimension_semantics = [#tpu.dimension_semantics<parallel>, #tpu.dimension_semantics<arbitrary>], iteration_bounds = array<i64: 1, 1>, scalar_prefetch = 0 : i64, scratch_operands = 1 : i64, tpu.core_type = #tpu.core_type<tc>, window_params = [{transform_indices = @transform_0, window_bounds = array<i64: 16, 128>}, {transform_indices = @transform_1, window_bounds = array<i64: 128, 64>}, {transform_indices = @transform_2, window_bounds = array<i64: 1, 64>}, {transform_indices = @transform_3, window_bounds = array<i64: 64, 128>}, {pipeline_mode = #tpu.pipeline_mode<synchronous>, transform_indices = @transform_4, window_bounds = array<i64: 1, 128>}, {transform_indices = @transform_5, window_bounds = array<i64: 16, 128>}]} {
    %c0_i32 = arith.constant 0 : i32
    %0 = arith.cmpi eq, %arg1, %c0_i32 : i32
    %1 = arith.extui %0 : i1 to i32
    %c0_i32_0 = arith.constant 0 : i32
    %2 = arith.cmpi ne, %1, %c0_i32_0 : i32
    scf.if %2 {
      %cst_16 = arith.constant 0.000000e+00 : f32
      %19 = vector.broadcast %cst_16 : f32 to vector<16x128xf32>
      %c0_17 = arith.constant 0 : index
      %c0_18 = arith.constant 0 : index
      %20 = vector.load %arg8[%c0_17, %c0_18] : memref<16x128xf32, #tpu.memory_space<vmem>>, vector<16x128xf32>
      tpu.vector_store %arg8[%c0_17, %c0_18], %19 {strides = array<i32>} : memref<16x128xf32, #tpu.memory_space<vmem>>, vector<16x128xf32>,
    } else {
    }
    %c0 = arith.constant 0 : index
    %c0_1 = arith.constant 0 : index
    %3 = vector.load %arg2[%c0, %c0_1] : memref<16x128xf32, #tpu.memory_space<vmem>>, vector<16x128xf32>
    %c0_2 = arith.constant 0 : index
    %c0_3 = arith.constant 0 : index
    %4 = vector.load %arg3[%c0_2, %c0_3] : memref<128x64xf32, #tpu.memory_space<vmem>>, vector<128x64xf32>
    %cst = arith.constant dense<0.000000e+00> : vector<16x64xf32>
    %5 = tpu.matmul %3, %4, %cst {dimension_numbers = #tpu.dot_dimension_numbers<[1], [0], [0], [1], [0, 0, 1, 1], [], []>} : vector<16x128xf32>, vector<128x64xf32>, vector<16x64xf32> -> vector<16x64xf32>
    %c0_4 = arith.constant 0 : index
    %c0_5 = arith.constant 0 : index
    %6 = vector.load %arg4[%c0_4, %c0_5] : memref<1x64xf32, #tpu.memory_space<vmem>>, vector<1x64xf32>
    %7 = vector.broadcast %6 : vector<1x64xf32> to vector<16x64xf32>
    %8 = arith.addf %5, %7 : vector<16x64xf32>
    %cst_6 = arith.constant 0.000000e+00 : f32
    %9 = vector.broadcast %cst_6 : f32 to vector<16x64xf32>
    %10 = arith.maximumf %8, %9 : vector<16x64xf32>
    %c0_7 = arith.constant 0 : index
    %c0_8 = arith.constant 0 : index
    %11 = vector.load %arg8[%c0_7, %c0_8] : memref<16x128xf32, #tpu.memory_space<vmem>>, vector<16x128xf32>
    %c0_9 = arith.constant 0 : index
    %c0_10 = arith.constant 0 : index
    %12 = vector.load %arg5[%c0_9, %c0_10] : memref<64x128xf32, #tpu.memory_space<vmem>>, vector<64x128xf32>
    %cst_11 = arith.constant dense<0.000000e+00> : vector<16x128xf32>
    %13 = tpu.matmul %10, %12, %cst_11 {dimension_numbers = #tpu.dot_dimension_numbers<[1], [0], [0], [1], [0, 0, 1, 1], [], []>} : vector<16x64xf32>, vector<64x128xf32>, vector<16x128xf32> -> vector<16x128xf32>
    %14 = arith.addf %11, %13 : vector<16x128xf32>
    %c0_12 = arith.constant 0 : index
    %c0_13 = arith.constant 0 : index
    %15 = vector.load %arg8[%c0_12, %c0_13] : memref<16x128xf32, #tpu.memory_space<vmem>>, vector<16x128xf32>
    tpu.vector_store %arg8[%c0_12, %c0_13], %14 {strides = array<i32>} : memref<16x128xf32, #tpu.memory_space<vmem>>, vector<16x128xf32>,
    %c0_i32_14 = arith.constant 0 : i32
    %16 = arith.cmpi eq, %arg1, %c0_i32_14 : i32
    %17 = arith.extui %16 : i1 to i32
    %c0_i32_15 = arith.constant 0 : i32
    %18 = arith.cmpi ne, %17, %c0_i32_15 : i32
    scf.if %18 {
      %c0_16 = arith.constant 0 : index
      %c0_17 = arith.constant 0 : index
      %19 = vector.load %arg8[%c0_16, %c0_17] : memref<16x128xf32, #tpu.memory_space<vmem>>, vector<16x128xf32>
      %c0_18 = arith.constant 0 : index
      %c0_19 = arith.constant 0 : index
      %20 = vector.load %arg6[%c0_18, %c0_19] : memref<1x128xf32, #tpu.memory_space<vmem>>, vector<1x128xf32>
      %21 = vector.broadcast %20 : vector<1x128xf32> to vector<16x128xf32>
      %22 = arith.addf %19, %21 : vector<16x128xf32>
      %c0_20 = arith.constant 0 : index
      %c0_21 = arith.constant 0 : index
      %23 = vector.load %arg7[%c0_20, %c0_21] : memref<16x128xf32, #tpu.memory_space<vmem>>, vector<16x128xf32>
      tpu.vector_store %arg7[%c0_20, %c0_21], %22 {strides = array<i32>} : memref<16x128xf32, #tpu.memory_space<vmem>>, vector<16x128xf32>,
    } else {
    }
    return
  }
  func.func @transform_0(%arg0: i32, %arg1: i32) -> (i32, i32) {
    %c0_i32 = arith.constant 0 : i32
    %c0_i32_0 = arith.constant 0 : i32
    return %arg0, %c0_i32 : i32, i32
  }
  func.func @transform_1(%arg0: i32, %arg1: i32) -> (i32, i32) {
    %c0_i32 = arith.constant 0 : i32
    %c0_i32_0 = arith.constant 0 : i32
    return %c0_i32, %arg1 : i32, i32
  }
  func.func @transform_2(%arg0: i32, %arg1: i32) -> (i32, i32) {
    %c0_i32 = arith.constant 0 : i32
    %c0_i32_0 = arith.constant 0 : i32
    return %c0_i32, %arg1 : i32, i32
  }
  func.func @transform_3(%arg0: i32, %arg1: i32) -> (i32, i32) {
    %c0_i32 = arith.constant 0 : i32
    %c0_i32_0 = arith.constant 0 : i32
    return %arg1, %c0_i32 : i32, i32
  }
  func.func @transform_4(%arg0: i32, %arg1: i32) -> (i32, i32) {
    %c0_i32 = arith.constant 0 : i32
    %c0_i32_0 = arith.constant 0 : i32
    %c0_i32_1 = arith.constant 0 : i32
    return %c0_i32, %c0_i32_0 : i32, i32
  }
  func.func @transform_5(%arg0: i32, %arg1: i32) -> (i32, i32) {
    %c0_i32 = arith.constant 0 : i32
    %c0_i32_0 = arith.constant 0 : i32
    return %arg0, %c0_i32 : i32, i32
  }
}

</mosaic_0001>

<bundles_post_ra>
// kernel: tpu_custom_call.1
= control target key start
LH: loop header
LB: loop body
LE: loop exit
PB: predicated region body
PF: predicated region fallthrough
CT: control target
= control target key end

     0   :  { %s488_s0 = inlined_call_operand.vmem [shape: f32[16,128], index: 0, kind: input, shape index: {}]   ;;  %s489_s1 = inlined_call_operand.vmem [shape: f32[128,64], index: 1, kind: input, shape index: {}]   ;;  %s490_s2 = inlined_call_operand.vmem [shape: f32[1,64], index: 2, kind: input, shape index: {}]   ;;  %s491_s3 = inlined_call_operand.vmem [shape: f32[64,128], index: 3, kind: input, shape index: {}]   ;;  %s492_s4 = inlined_call_operand.vmem [shape: f32[1,128], index: 4, kind: input, shape index: {}]   ;;  %s493_s5 = inlined_call_operand.hbm [shape: f32[16,128], index: 5, kind: output, shape index: {}]  }
   0x1   :  { %v44_v0 = vld [vmem:[%s489_s1 + $0x78] sm:$0xff]  ;;  %v43_v1 = vld [vmem:[%s489_s1 + $0x70] sm:$0xff]  ;;  %v42_v2 = vld [vmem:[%s489_s1 + $0x68] sm:$0xff] }
   0x2   :  { %289 = vmatprep.subr.mxu0 %v44_v0  ;;  %v41_v3 = vld [vmem:[%s489_s1 + $0x60] sm:$0xff]  ;;  %v40_v5 = vld [vmem:[%s489_s1 + $0x58] sm:$0xff]  ;;  %v137_v7 = vld [vmem:[%s491_s3 + $0x30] sm:$0xff] }
   0x3   :  { %290 = vmatpush3.msra.mxu0 %v44_v0  ;;  %v27_v4 = vld [vmem:[%s488_s0] sm:$0xff]  ;;  %v138_v6 = vld [vmem:[%s491_s3 + $0x38] sm:$0xff] }
   0x4   :  { %291 = vmatprep.subr.mxu0 %v43_v1  ;;  %321 = vmatprep.mubr.f32.mxu0 %v27_v4 }
   0x5   :  { %292 = vmatpush3.msra.mxu0 %v43_v1  ;;  %324 = vmatprep.subr.mxu1 %v138_v6 }
   0x6   :  { %293 = vmatprep.subr.mxu0 %v42_v2 }
   0x7   :  { %294 = vmatpush3.msra.mxu0 %v42_v2 }
   0x8   :  { %295 = vmatprep.subr.mxu0 %v41_v3 }
   0x9   :  { %10 = vsyncpa [#allocation4], 0  ;;  %296 = vmatpush3.msra.mxu0 %v41_v3  ;;  %v39_v8 = vld [vmem:[%s489_s1 + $0x50] sm:$0xff]  ;;  %325 = vmatpush3.msra.mxu1 %v138_v6  ;;  %v136_v9 = vld [vmem:[%s491_s3 + $0x28] sm:$0xff]  ;;  %vm139_vm0 = vcmask 523264  }
   0xa   :  { %297 = vmatprep.subr.mxu0 %v40_v5  ;;  %326 = vmatprep.subr.mxu1 %v137_v7  ;;  %v38_v10 = vld [vmem:[%s489_s1 + $0x48] sm:$0xff]  ;;  %v135_v11 = vld [vmem:[%s491_s3 + $0x20] sm:$0xff]  ;;  %v36_v13 = vld [vmem:[%s489_s1 + $0x38] sm:$0xff] }
   0xb   :  { %298 = vmatpush3.msra.mxu0 %v40_v5  ;;  %327 = vmatpush3.msra.mxu1 %v137_v7  ;;  %v37_v12 = vld [vmem:[%s489_s1 + $0x40] sm:$0xff]  ;;  %v35_v14 = vld [vmem:[%s489_s1 + $0x30] sm:$0xff]  ;;  %v34_v15 = vld [vmem:[%s489_s1 + $0x28] sm:$0xff] }
   0xc   :  { %299 = vmatprep.subr.mxu0 %v39_v8  ;;  %328 = vmatprep.subr.mxu1 %v136_v9  ;;  %v33_v16 = vld [vmem:[%s489_s1 + $0x20] sm:$0xff]  ;;  %v32_v17 = vld [vmem:[%s489_s1 + $0x18] sm:$0xff]  ;;  %v31_v18 = vld [vmem:[%s489_s1 + $0x10] sm:$0xff] }
   0xd   :  { %300 = vmatpush3.msra.mxu0 %v39_v8  ;;  %329 = vmatpush3.msra.mxu1 %v136_v9  ;;  %v30_v19 = vld [vmem:[%s489_s1 + $0x8] sm:$0xff]  ;;  %v29_v20 = vld [vmem:[%s489_s1] sm:$0xff]  ;;  %v134_v22 = vld [vmem:[%s491_s3 + $0x18] sm:$0xff] }
   0xe   :  { %301 = vmatprep.subr.mxu0 %v38_v10  ;;  %330 = vmatprep.subr.mxu1 %v135_v11  ;;  %v28_v21 = vld [vmem:[%s488_s0 + $0x8] sm:$0xff]  ;;  %v133_v23 = vld [vmem:[%s491_s3 + $0x10] sm:$0xff]  ;;  %v131_v25 = vld [vmem:[%s491_s3] sm:$0xff] }
   0xf   :  { %302 = vmatpush3.msra.mxu0 %v38_v10  ;;  %331 = vmatpush3.msra.mxu1 %v135_v11  ;;  %v132_v24 = vld [vmem:[%s491_s3 + $0x8] sm:$0xff]  ;;  %v257_v26 = vld [vmem:[%s490_s2] ss:$0 sm:$0xff]  ;;  %s368_s3 = smov [#allocation3]  }
  0x10   :  { %303 = vmatprep.subr.mxu0 %v37_v12  ;;  %332 = vmatprep.subr.mxu1 %v134_v22  ;;  %v260_v33 = vld [vmem:[%s492_s4] ss:$0 sm:$0xff]  ;;  %s246_s22 = sshll.u32 %s368_s3, 4  ;;  %s247_s22 = int_to_ptr.vmem [resolvable:$true] %s246_s22 }
  0x11   :  { %304 = vmatpush3.msra.mxu0 %v37_v12  ;;  %333 = vmatpush3.msra.mxu1 %v134_v22  ;;  %s346_s2 = scalar_lea.vmem %s247_s22, 256  ;;  %p351_p1 = scmp.lt.s32.totalorder %s247_s22, %s247_s22 }
  0x12   :  { %305 = vmatprep.subr.mxu0 %v36_v13  ;;  %334 = vmatprep.subr.mxu1 %v133_v23  ;;  %p347_p0 = scmp.ne.s32.totalorder %s247_s22, %s346_s2  ;;  %p352_p2 = scmp.lt.s32.totalorder %s346_s2, %s346_s2 }
  0x13   :  { %306 = vmatpush3.msra.mxu0 %v36_v13  ;;  %335 = vmatpush3.msra.mxu1 %v133_v23 }
  0x14   :  { %307 = vmatprep.subr.mxu0 %v35_v14  ;;  %336 = vmatprep.subr.mxu1 %v132_v24  ;;  %p353_p3 = por %p352_p2, %p351_p1 }
  0x15   :  { %308 = vmatpush3.msra.mxu0 %v35_v14  ;;  %337 = vmatpush3.msra.mxu1 %v132_v24 }
  0x16   :  { %309 = vmatprep.subr.mxu0 %v34_v15  ;;  %338 = vmatprep.subr.mxu1 %v131_v25  ;;  %p354_p4 = pnand %p353_p3, %p347_p0 }
  0x17   :  { %310 = vmatpush3.msra.mxu0 %v34_v15  ;;  %339 = vmatpush3.msra.mxu1 %v131_v25 }
  0x18   :  { %311 = vmatprep.subr.mxu0 %v33_v16 }
  0x19   :  { %312 = vmatpush3.msra.mxu0 %v33_v16 }
  0x1a   :  { %313 = vmatprep.subr.mxu0 %v32_v17 }
  0x1b   :  { %314 = vmatpush3.msra.mxu0 %v32_v17 }
  0x1c   :  { %315 = vmatprep.subr.mxu0 %v31_v18 }
  0x1d   :  { %316 = vmatpush3.msra.mxu0 %v31_v18 }
  0x1e   :  { %317 = vmatprep.subr.mxu0 %v30_v19 }
  0x1f   :  { %318 = vmatpush3.msra.mxu0 %v30_v19 }
  0x20   :  { %319 = vmatprep.subr.mxu0 %v29_v20 }
  0x21   :  { %320 = vmatpush3.msra.mxu0 %v29_v20 }
  0x22   :  { %322 = vmatmul.mubr.f32.vlgmr.msra.gmra.mxu0 %v28_v21 }
  0xe2   :  { %v323_v27 = vpop.f32.mrf.mxu0 }
  0xe3   :  { %v124_v28 = vadd.f32 %v323_v27, %v257_v26 }
  0xe4   :  { %v118_v29 = vpop.f32.mrf.mxu0 }
  0xe5   :  { %v119_v30 = vadd.f32 %v257_v26, %v118_v29  ;;  %v128_v32 = vmax.f32 %v124_v28, 0.0 }
  0xe7   :  { %v127_v31 = vmax.f32 %v119_v30, 0.0 }
  0xe9   :  { %340 = vmatprep.mubr.msk.f32.mxu1 %vm139_vm0, %v127_v31 }
  0xea   :  { %341 = vmatmul.mubr.msk.f32.vlgmr.msra.gmra.mxu1 %vm139_vm0, %v128_v32 }
 0x1aa   :  { %v342_v34 = vpop.f32.mrf.mxu1 }
 0x1ab   :  { %v238_v35 = vadd.f32 %v342_v34, %v260_v33 }
 0x1ac   :  { %v212_v36 = vpop.f32.mrf.mxu1 }
 0x1ad   :  { %240 = vst [vmem:[#allocation3 + $0x8] sm:$0xff] %v238_v35  ;;  %v237_v37 = vadd.f32 %v260_v33, %v212_v36 }
 0x1af   :  { %239 = vst [vmem:[#allocation3] sm:$0xff] %v237_v37 }
 0x1b0   :  { %357 = shalt.err (!%p354_p4)
}
 0x1b1   :  { %s369_s23 = smov 128   ;;  %s370_s24 = smov 8  }
 0x1b2   :  { %252 = dma.vmem_to_hbm [thread:$0]  %s247_s22, 256, %s493_s5, [#allocation4], %s369_s23, %s369_s23, %s370_s24  }
 0x1b3   :  { %366 = dma.done.wait [#allocation4], 256  }
 0x1b4   :  { %367 = vsyncadd [#allocation4], 4294967040 }
 0x1b5   :  { %256 = vsyncpa [#allocation4], 1 }

</bundles_post_ra>
